<compile_context>
chip_gen: v7x
topology: tpu7x:2x2x1
jax: 0.10.0
libtpu: 0.0.40
codegen_flags: <defaults>
</compile_context>

<pallas_src>
import jax
import jax.numpy as jnp
from jax import lax
from jax.experimental import pallas as pl
from jax.experimental.pallas import tpu as pltpu

BN_EPS = 1e-5


def _make_resblock_kernel(L, cout, compute_dtype):
    def kernel(x_ref, w1_ref, w2_ref, sc_ref, o_ref):
        nl = x_ref.shape[1]
        lane = lax.broadcasted_iota(jnp.int32, (1, nl), 1)
        pos = lane % L                       # position within each length-L segment
        at_first = pos == 0
        at_last = pos == (L - 1)

        def stack3(h):
            # im2col for k=3, pad=1: stack [h[l-1] | h[l] | h[l+1]] along channels,
            # zero-filled at sequence ends. Rolls go to the XLU, masks to the VPU
            # (no MXU work); masking per-segment prevents cross-batch leakage on
            # the flattened N*L axis.
            prev = jnp.where(at_first, 0.0, pltpu.roll(h, 1, axis=1))
            nxt = jnp.where(at_last, 0.0, pltpu.roll(h, nl - 1, axis=1))
            return jnp.concatenate([prev, h, nxt], axis=0).astype(compute_dtype)

        def bn(y, g, be, relu):
            # Training-mode BatchNorm1d, single pass: var = E[y^2] - E[y]^2,
            # then one fused scale/shift pass. rsqrt rides the (idle) EUP slot.
            inv_n = 1.0 / y.shape[1]
            m = jnp.sum(y, axis=1, keepdims=True) * inv_n
            ex2 = jnp.sum(y * y, axis=1, keepdims=True) * inv_n
            scale = g * lax.rsqrt(ex2 - m * m + BN_EPS)
            z = y * scale + (be - m * scale)
            return jnp.maximum(z, 0.0) if relu else z

        # packed per-channel scalars: [gamma1, beta1, gamma2, beta2, bt]
        g1, be1 = sc_ref[:, 0:1], sc_ref[:, 1:2]
        g2, be2 = sc_ref[:, 2:3], sc_ref[:, 3:4]
        bt = sc_ref[:, 4:5]

        # conv1 (k=3, pad='same') and the 1x1 shortcut fused into one MXU matmul.
        xs = stack3(x_ref[...])                                            # (3*Cin, N*L)
        y = jnp.dot(w1_ref[...], xs, preferred_element_type=jnp.float32)   # (2*Cout, N*L)
        xt = y[cout:, :] + bt                                              # shortcut branch
        h = bn(y[:cout, :], g1, be1, relu=True)                            # conv1 -> BN -> ReLU

        # conv2 (k=3, pad=1) -> BN
        h = jnp.dot(w2_ref[...], stack3(h), preferred_element_type=jnp.float32)
        h = bn(h, g2, be2, relu=False)

        o_ref[...] = jnp.maximum(h + xt, 0.0)                              # residual + ReLU

    return kernel


def resblock_forward(x_ncl, params, *, compute_dtype=jnp.bfloat16):
    """x_ncl: (N, Cin, L) float32 in PyTorch NCL convention -> (N, Cout, L) float32."""
    N, Cin, L = x_ncl.shape
    w1, b1, g1, be1, w2, b2, g2, be2, wt, bt = params
    Cout = w1.shape[0]
    del b1, b2  # per-channel conv biases cancel exactly in training-mode BatchNorm

    # channels-first with (N, L) flattened onto lanes
    x_flat = jnp.transpose(x_ncl, (1, 0, 2)).reshape(Cin, N * L).astype(jnp.float32)

    # im2col weight blobs, tap order [l-1 | l | l+1]; the 1x1 shortcut occupies the
    # center-tap block of extra output rows so conv1 + shortcut share one matmul.
    w1_cols = jnp.concatenate([w1[:, :, 0], w1[:, :, 1], w1[:, :, 2]], axis=1)     # (Cout, 3Cin)
    zpad = jnp.zeros((Cout, Cin), w1.dtype)
    wt_cols = jnp.concatenate([zpad, wt[:, :, 0], zpad], axis=1)                   # (Cout, 3Cin)
    w1_blob = jnp.concatenate([w1_cols, wt_cols], axis=0).astype(compute_dtype)    # (2Cout, 3Cin)
    w2_blob = jnp.concatenate([w2[:, :, 0], w2[:, :, 1], w2[:, :, 2]],
                              axis=1).astype(compute_dtype)                        # (Cout, 3Cout)

    # all per-channel scalars in a single small input
    scalars = jnp.stack([g1, be1, g2, be2, bt], axis=1).astype(jnp.float32)        # (Cout, 5)

    vmem = pl.BlockSpec(memory_space=pltpu.MemorySpace.VMEM)
    out_flat = pl.pallas_call(
        _make_resblock_kernel(L, Cout, compute_dtype),
        out_shape=jax.ShapeDtypeStruct((Cout, N * L), jnp.float32),
        in_specs=[vmem] * 4,
        out_specs=vmem,
    )(x_flat, w1_blob, w2_blob, scalars)

    # TODO(synk): at production sizes, add a grid over the N*L axis ("parallel") with a
    # two-pass BN stats reduction, and fuse consecutive ResBlocks (and the Gaussian
    # low-pass / cls head of FilterResNet54Double) into one pallas_call to amortize
    # launch/DMA overhead and fit v7x's 64 MiB VMEM / dual TensorCores.
    return jnp.transpose(out_flat.reshape(Cout, N, L), (1, 0, 2))  # (N, Cout, L)


def _reference(x, params):
    """Pure-JAX reference mirroring the PyTorch forward (train-mode BN)."""
    w1, b1, g1, be1, w2, b2, g2, be2, wt, bt = params

    def conv(h, w, b, pad):
        y = lax.conv_general_dilated(h, w, (1,), [(pad, pad)],
                                     dimension_numbers=('NCH', 'OIH', 'NCH'),
                                     precision=lax.Precision.HIGHEST)
        return y + b[None, :, None]

    def bn(y, g, be):
        m = y.mean(axis=(0, 2), keepdims=True)
        v = ((y - m) ** 2).mean(axis=(0, 2), keepdims=True)
        return (y - m) * lax.rsqrt(v + BN_EPS) * g[None, :, None] + be[None, :, None]

    h = jax.nn.relu(bn(conv(x, w1, b1, 1), g1, be1))
    h = bn(conv(h, w2, b2, 1), g2, be2)
    xt = conv(x, wt, bt, 0)
    return jax.nn.relu(h + xt)


if __name__ == "__main__":
    N, Cin, Cout, L = 2, 8, 16, 128

    key = jax.random.PRNGKey(0)
    ks = jax.random.split(key, 12)
    x = jax.random.normal(ks[0], (N, Cin, L), jnp.float32)

    w1 = 0.2 * jax.random.normal(ks[1], (Cout, Cin, 3), jnp.float32)
    b1 = 0.1 * jax.random.normal(ks[2], (Cout,), jnp.float32)
    g1 = 1.0 + 0.1 * jax.random.normal(ks[3], (Cout,), jnp.float32)
    be1 = 0.1 * jax.random.normal(ks[4], (Cout,), jnp.float32)
    w2 = 0.2 * jax.random.normal(ks[5], (Cout, Cout, 3), jnp.float32)
    b2 = 0.1 * jax.random.normal(ks[6], (Cout,), jnp.float32)
    g2 = 1.0 + 0.1 * jax.random.normal(ks[7], (Cout,), jnp.float32)
    be2 = 0.1 * jax.random.normal(ks[8], (Cout,), jnp.float32)
    wt = 0.3 * jax.random.normal(ks[9], (Cout, Cin, 1), jnp.float32)
    bt = 0.1 * jax.random.normal(ks[10], (Cout,), jnp.float32)
    params = (w1, b1, g1, be1, w2, b2, g2, be2, wt, bt)

    out = jax.block_until_ready(resblock_forward(x, params))
    ref = jax.block_until_ready(_reference(x, params))

    assert out.shape == (N, Cout, L), out.shape
    if not bool(jnp.allclose(out, ref, atol=5e-2, rtol=5e-2)):
        raise AssertionError("Pallas ResBlock output mismatch vs JAX reference")
    print("KERNEL_OK")
</pallas_src>

<mosaic_0001>
module attributes {stable_mosaic.version = 11 : i64} {
  func.func @kernel(%arg0: memref<8x256xf32, #tpu.memory_space<vmem>>, %arg1: memref<32x24xbf16, #tpu.memory_space<vmem>>, %arg2: memref<16x48xbf16, #tpu.memory_space<vmem>>, %arg3: memref<16x5xf32, #tpu.memory_space<vmem>>, %arg4: memref<16x256xf32, #tpu.memory_space<vmem>>) attributes {dimension_semantics = [], scalar_prefetch = 0 : i64, scratch_operands = 0 : i64, tpu.core_type = #tpu.core_type<tc>} {
    %0 = tpu.iota {dimensions = array<i32: 1>} : vector<1x256xi32>
    %c128_i32 = arith.constant 128 : i32
    %c0_i32 = arith.constant 0 : i32
    %1 = arith.cmpi eq, %c128_i32, %c0_i32 : i32
    %c1_i32 = arith.constant 1 : i32
    %2 = arith.select %1, %c1_i32, %c128_i32 : i32
    %3 = vector.broadcast %2 : i32 to vector<1x256xi32>
    %4 = arith.remsi %0, %3 : vector<1x256xi32>
    %c0_i32_0 = arith.constant 0 : i32
    %5 = vector.broadcast %c0_i32_0 : i32 to vector<1x256xi32>
    %6 = arith.cmpi ne, %4, %5 : vector<1x256xi32>
    %c0_i32_1 = arith.constant 0 : i32
    %7 = vector.broadcast %c0_i32_1 : i32 to vector<1x256xi32>
    %8 = arith.cmpi slt, %4, %7 : vector<1x256xi32>
    %c0_i32_2 = arith.constant 0 : i32
    %9 = arith.cmpi slt, %2, %c0_i32_2 : i32
    %10 = vector.broadcast %9 : i1 to vector<1x256xi1>
    %11 = vector.broadcast %10 : vector<1x256xi1> to vector<1x256xi1>
    %12 = arith.xori %8, %11 : vector<1x256xi1>
    %13 = arith.andi %12, %6 : vector<1x256xi1>
    %14 = vector.broadcast %2 : i32 to vector<1x256xi32>
    %15 = arith.addi %4, %14 : vector<1x256xi32>
    %16 = arith.select %13, %15, %4 : vector<1x256xi1>, vector<1x256xi32>
    %c0_i32_3 = arith.constant 0 : i32
    %17 = vector.broadcast %c0_i32_3 : i32 to vector<1x256xi32>
    %18 = arith.cmpi eq, %16, %17 : vector<1x256xi32>
    %c127_i32 = arith.constant 127 : i32
    %19 = vector.broadcast %c127_i32 : i32 to vector<1x256xi32>
    %20 = arith.cmpi eq, %16, %19 : vector<1x256xi32>
    %c0 = arith.constant 0 : index
    %c0_4 = arith.constant 0 : index
    %21 = vector.load %arg3[%c0, %c0_4] : memref<16x5xf32, #tpu.memory_space<vmem>>, vector<16x1xf32>
    %c0_5 = arith.constant 0 : index
    %c1 = arith.constant 1 : index
    %22 = vector.load %arg3[%c0_5, %c1] : memref<16x5xf32, #tpu.memory_space<vmem>>, vector<16x1xf32>
    %c0_6 = arith.constant 0 : index
    %c2 = arith.constant 2 : index
    %23 = vector.load %arg3[%c0_6, %c2] : memref<16x5xf32, #tpu.memory_space<vmem>>, vector<16x1xf32>
    %c0_7 = arith.constant 0 : index
    %c3 = arith.constant 3 : index
    %24 = vector.load %arg3[%c0_7, %c3] : memref<16x5xf32, #tpu.memory_space<vmem>>, vector<16x1xf32>
    %c0_8 = arith.constant 0 : index
    %c4 = arith.constant 4 : index
    %25 = vector.load %arg3[%c0_8, %c4] : memref<16x5xf32, #tpu.memory_space<vmem>>, vector<16x1xf32>
    %c0_9 = arith.constant 0 : index
    %c0_10 = arith.constant 0 : index
    %26 = vector.load %arg0[%c0_9, %c0_10] : memref<8x256xf32, #tpu.memory_space<vmem>>, vector<8x256xf32>
    %c1_i32_11 = arith.constant 1 : i32
    %27 = tpu.dynamic_rotate %26 by %c1_i32_11 dim 1 : vector<8x256xf32>, i32 -> vector<8x256xf32>
    %cst = arith.constant 0.000000e+00 : f32
    %28 = vector.shape_cast %18 : vector<1x256xi1> to vector<1x256xi1>
    %29 = vector.broadcast %28 : vector<1x256xi1> to vector<8x256xi1>
    %30 = vector.broadcast %cst : f32 to vector<8x256xf32>
    %31 = arith.select %29, %30, %27 : vector<8x256xi1>, vector<8x256xf32>
    %c255_i32 = arith.constant 255 : i32
    %32 = tpu.dynamic_rotate %26 by %c255_i32 dim 1 : vector<8x256xf32>, i32 -> vector<8x256xf32>
    %cst_12 = arith.constant 0.000000e+00 : f32
    %33 = vector.shape_cast %20 : vector<1x256xi1> to vector<1x256xi1>
    %34 = vector.broadcast %33 : vector<1x256xi1> to vector<8x256xi1>
    %35 = vector.broadcast %cst_12 : f32 to vector<8x256xf32>
    %36 = arith.select %34, %35, %32 : vector<8x256xi1>, vector<8x256xf32>
    %37 = tpu.concatenate %31, %26, %36 in 0 : vector<8x256xf32>, vector<8x256xf32>, vector<8x256xf32> -> vector<24x256xf32>
    %38 = arith.truncf %37 : vector<24x256xf32> to vector<24x256xbf16>
    %c0_13 = arith.constant 0 : index
    %c0_14 = arith.constant 0 : index
    %39 = vector.load %arg1[%c0_13, %c0_14] : memref<32x24xbf16, #tpu.memory_space<vmem>>, vector<32x24xbf16>
    %cst_15 = arith.constant dense<0.000000e+00> : vector<32x256xf32>
    %40 = tpu.matmul %39, %38, %cst_15 {dimension_numbers = #tpu.dot_dimension_numbers<[1], [0], [0], [1], [0, 0, 1, 1], [], []>} : vector<32x24xbf16>, vector<24x256xbf16>, vector<32x256xf32> -> vector<32x256xf32>
    %41 = vector.extract_strided_slice %40 {offsets = [16, 0], sizes = [16, 256], strides = [1, 1]} : vector<32x256xf32> to vector<16x256xf32>
    %42 = vector.broadcast %25 : vector<16x1xf32> to vector<16x256xf32>
    %43 = arith.addf %41, %42 : vector<16x256xf32>
    %44 = vector.extract_strided_slice %40 {offsets = [0, 0], sizes = [16, 256], strides = [1, 1]} : vector<32x256xf32> to vector<16x256xf32>
    %cst_16 = arith.constant dense<0.000000e+00> : vector<16xf32>
    %45 = vector.multi_reduction <add>, %44, %cst_16 [1] : vector<16x256xf32> to vector<16xf32>
    %46 = vector.shape_cast %45 : vector<16xf32> to vector<16x1xf32>
    %cst_17 = arith.constant 3.906250e-03 : f32
    %47 = vector.broadcast %cst_17 : f32 to vector<16x1xf32>
    %48 = arith.mulf %46, %47 : vector<16x1xf32>
    %49 = arith.mulf %44, %44 : vector<16x256xf32>
    %cst_18 = arith.constant dense<0.000000e+00> : vector<16xf32>
    %50 = vector.multi_reduction <add>, %49, %cst_18 [1] : vector<16x256xf32> to vector<16xf32>
    %51 = vector.shape_cast %50 : vector<16xf32> to vector<16x1xf32>
    %cst_19 = arith.constant 3.906250e-03 : f32
    %52 = vector.broadcast %cst_19 : f32 to vector<16x1xf32>
    %53 = arith.mulf %51, %52 : vector<16x1xf32>
    %54 = arith.mulf %48, %48 : vector<16x1xf32>
    %55 = arith.subf %53, %54 : vector<16x1xf32>
    %cst_20 = arith.constant 9.99999974E-6 : f32
    %56 = vector.broadcast %cst_20 : f32 to vector<16x1xf32>
    %57 = arith.addf %55, %56 : vector<16x1xf32>
    %58 = math.rsqrt %57 : vector<16x1xf32>
    %59 = arith.mulf %21, %58 : vector<16x1xf32>
    %60 = vector.broadcast %59 : vector<16x1xf32> to vector<16x256xf32>
    %61 = arith.mulf %44, %60 : vector<16x256xf32>
    %62 = arith.mulf %48, %59 : vector<16x1xf32>
    %63 = arith.subf %22, %62 : vector<16x1xf32>
    %64 = vector.broadcast %63 : vector<16x1xf32> to vector<16x256xf32>
    %65 = arith.addf %61, %64 : vector<16x256xf32>
    %cst_21 = arith.constant 0.000000e+00 : f32
    %66 = vector.broadcast %cst_21 : f32 to vector<16x256xf32>
    %67 = arith.maximumf %65, %66 : vector<16x256xf32>
    %c0_22 = arith.constant 0 : index
    %c0_23 = arith.constant 0 : index
    %68 = vector.load %arg2[%c0_22, %c0_23] : memref<16x48xbf16, #tpu.memory_space<vmem>>, vector<16x48xbf16>
    %c1_i32_24 = arith.constant 1 : i32
    %69 = tpu.dynamic_rotate %67 by %c1_i32_24 dim 1 : vector<16x256xf32>, i32 -> vector<16x256xf32>
    %cst_25 = arith.constant 0.000000e+00 : f32
    %70 = vector.shape_cast %18 : vector<1x256xi1> to vector<1x256xi1>
    %71 = vector.broadcast %70 : vector<1x256xi1> to vector<16x256xi1>
    %72 = vector.broadcast %cst_25 : f32 to vector<16x256xf32>
    %73 = arith.select %71, %72, %69 : vector<16x256xi1>, vector<16x256xf32>
    %c255_i32_26 = arith.constant 255 : i32
    %74 = tpu.dynamic_rotate %67 by %c255_i32_26 dim 1 : vector<16x256xf32>, i32 -> vector<16x256xf32>
    %cst_27 = arith.constant 0.000000e+00 : f32
    %75 = vector.shape_cast %20 : vector<1x256xi1> to vector<1x256xi1>
    %76 = vector.broadcast %75 : vector<1x256xi1> to vector<16x256xi1>
    %77 = vector.broadcast %cst_27 : f32 to vector<16x256xf32>
    %78 = arith.select %76, %77, %74 : vector<16x256xi1>, vector<16x256xf32>
    %79 = tpu.concatenate %73, %67, %78 in 0 : vector<16x256xf32>, vector<16x256xf32>, vector<16x256xf32> -> vector<48x256xf32>
    %80 = arith.truncf %79 : vector<48x256xf32> to vector<48x256xbf16>
    %cst_28 = arith.constant dense<0.000000e+00> : vector<16x256xf32>
    %81 = tpu.matmul %68, %80, %cst_28 {dimension_numbers = #tpu.dot_dimension_numbers<[1], [0], [0], [1], [0, 0, 1, 1], [], []>} : vector<16x48xbf16>, vector<48x256xbf16>, vector<16x256xf32> -> vector<16x256xf32>
    %cst_29 = arith.constant dense<0.000000e+00> : vector<16xf32>
    %82 = vector.multi_reduction <add>, %81, %cst_29 [1] : vector<16x256xf32> to vector<16xf32>
    %83 = vector.shape_cast %82 : vector<16xf32> to vector<16x1xf32>
    %cst_30 = arith.constant 3.906250e-03 : f32
    %84 = vector.broadcast %cst_30 : f32 to vector<16x1xf32>
    %85 = arith.mulf %83, %84 : vector<16x1xf32>
    %86 = arith.mulf %81, %81 : vector<16x256xf32>
    %cst_31 = arith.constant dense<0.000000e+00> : vector<16xf32>
    %87 = vector.multi_reduction <add>, %86, %cst_31 [1] : vector<16x256xf32> to vector<16xf32>
    %88 = vector.shape_cast %87 : vector<16xf32> to vector<16x1xf32>
    %cst_32 = arith.constant 3.906250e-03 : f32
    %89 = vector.broadcast %cst_32 : f32 to vector<16x1xf32>
    %90 = arith.mulf %88, %89 : vector<16x1xf32>
    %91 = arith.mulf %85, %85 : vector<16x1xf32>
    %92 = arith.subf %90, %91 : vector<16x1xf32>
    %cst_33 = arith.constant 9.99999974E-6 : f32
    %93 = vector.broadcast %cst_33 : f32 to vector<16x1xf32>
    %94 = arith.addf %92, %93 : vector<16x1xf32>
    %95 = math.rsqrt %94 : vector<16x1xf32>
    %96 = arith.mulf %23, %95 : vector<16x1xf32>
    %97 = vector.broadcast %96 : vector<16x1xf32> to vector<16x256xf32>
    %98 = arith.mulf %81, %97 : vector<16x256xf32>
    %99 = arith.mulf %85, %96 : vector<16x1xf32>
    %100 = arith.subf %24, %99 : vector<16x1xf32>
    %101 = vector.broadcast %100 : vector<16x1xf32> to vector<16x256xf32>
    %102 = arith.addf %98, %101 : vector<16x256xf32>
    %103 = arith.addf %102, %43 : vector<16x256xf32>
    %cst_34 = arith.constant 0.000000e+00 : f32
    %104 = vector.broadcast %cst_34 : f32 to vector<16x256xf32>
    %105 = arith.maximumf %103, %104 : vector<16x256xf32>
    %c0_35 = arith.constant 0 : index
    %c0_36 = arith.constant 0 : index
    %106 = vector.load %arg4[%c0_35, %c0_36] : memref<16x256xf32, #tpu.memory_space<vmem>>, vector<16x256xf32>
    tpu.vector_store %arg4[%c0_35, %c0_36], %105 {strides = array<i32>} : memref<16x256xf32, #tpu.memory_space<vmem>>, vector<16x256xf32>,
    return
  }
}

</mosaic_0001>

<bundles_post_ra>
// kernel: tpu_custom_call.1
= control target key start
LH: loop header
LB: loop body
LE: loop exit
PB: predicated region body
PF: predicated region fallthrough
CT: control target
= control target key end

     0   :  { %v563_v3 = vmov 0   ;;  %s564_s19 = smov 1   ;;  %s739_s0 = inlined_call_operand.vmem [shape: f32[8,256], index: 0, kind: input, shape index: {}]   ;;  %s740_s1 = inlined_call_operand.vmem [shape: bf16[32,24], index: 1, kind: input, shape index: {}]   ;;  %s741_s2 = inlined_call_operand.vmem [shape: bf16[16,48], index: 2, kind: input, shape index: {}]   ;;  %s742_s3 = inlined_call_operand.vmem [shape: f32[16,5], index: 3, kind: input, shape index: {}]   ;;  %s743_s4 = inlined_call_operand.hbm [shape: f32[16,256], index: 4, kind: output, shape index: {}]  }
   0x1   :  { %v52_v0 = vld [vmem:[%s739_s0] sm:$0xff]  ;;  %v53_v1 = vld [vmem:[%s739_s0 + $0x8] sm:$0xff]  ;;  %144 = vmatprep.mubr.bf16.mxu0 %v563_v3  ;;  %501 = vset.pattern.permute.xlu1 %v563_v3 }
   0x2   :  { %v491_v2 = vpack.i.bf16 %v53_v1, %v52_v0  ;;  %334 = vmatprep.mubr.bf16.mxu1 %v563_v3 }
   0x4   :  { %492 = vrot.lane.b32.xlu0 %v491_v2, %s564_s19 }
   0x5   :  { %9 = vsyncpa [#allocation3], 0  ;;  %s565_s20 = smov 127   ;;  %v19_v4 = vlaneseq  ;;  %vm566_vm3 = vmmov 1   ;;  %vm105_vm9 = vcmask 1043456   ;;  %v528_v27 = vld [vmem:[%s740_s1] sm:$0xff]  }
   0x6   :  { %vm98_vm10 = vcmask 195584   ;;  %v567_v53 = vmov 1   ;;  %v645_v55 = vld [vmem:[%s742_s3] sm:$0xff]  ;;  %v651_v59 = vld [vmem:[%s742_s3 + $0x8] sm:$0xff] }
   0x7   :  { %v607_v5 = vand.u32 127, %v19_v4  ;;  %502 = vset.pattern.permute.xlu0 %v567_v53 }
   0x8   :  { %497 = vrot.lane.b32.xlu0 %v491_v2, %s565_s20 }
   0x9   :  { %v21_v6 = vadd.s32 128, %v607_v5  ;;  %vm58_vm0 = vcmp.lt.s32.totalorder %v607_v5, 1  ;;  %vm479_vm2 = vcmp.ne.s32.totalorder %v607_v5, 0  ;;  %vm71_vm5 = vcmp.lt.s32.totalorder %v607_v5, 127 }
   0xa   :  { %vm450_vm6 = vmpackc.low %vm566_vm3, %vm479_vm2  ;;  %vm48_vm8 = vcmp.eq.s32.totalorder %v607_v5, 127 }
   0xb   :  { %v33_v7 = vand.u32 127, %v21_v6  ;;  %vm464_vm12 = vmpackc.low %vm479_vm2, %vm479_vm2 }
   0xc   :  { %vm472_vm14 = vmneg %vm48_vm8 }
   0xd   :  { %vm611_vm1 = vcmp.ne.s32.totalorder %v33_v7, 0  ;;  %vm625_vm7 = vcmp.eq.s32.totalorder %v33_v7, 127 }
   0xe   :  { %vm446_vm4 = vmpackc.low %vm566_vm3, %vm611_vm1 }
   0xf   :  { %vm459_vm11 = vmpackc.low %vm611_vm1, %vm611_vm1  ;;  %vm298_vm1 = vcmask 392192  }
  0x10   :  { %vm467_vm13 = vmneg %vm625_vm7 }
  0x11   :  { %vm469_vm15 = vmpackc.low %vm467_vm13, %vm467_vm13 }
  0x76   :  { %v493_v8 = vpop.permute.xlu0 %492 }
  0x77   :  { %v495_v10 = vunpack.i.h.bf16 %v493_v8  ;;  %v494_v11 = vunpack.i.l.bf16 %v493_v8 }
  0x79   :  { %v59_v12 = vsel %vm58_vm0, %v494_v11, %v495_v10  ;;  %v60_v13 = vsel %vm58_vm0, %v495_v10, %v494_v11 }
  0x7a   :  { %v498_v14 = vpop.permute.xlu0 %497  ;;  %v447_v15 = vpack.c.bf16 %v53_v1, %v59_v12  ;;  %v451_v16 = vpack.c.bf16 %v52_v0, %v60_v13 }
  0x7b   :  { %v500_v17 = vunpack.i.h.bf16 %v498_v14  ;;  %v499_v18 = vunpack.i.l.bf16 %v498_v14 }
  0x7c   :  { %448 = vmatprep.subr.msk.bf16.mxu0 %vm446_vm4, %v447_v15 }
  0x7d   :  { %v73_v20 = vsel %vm71_vm5, %v500_v17, %v499_v18  ;;  %452 = vmatpush1.bf16.msk.msra.mxu0 %vm450_vm6, %v451_v16  ;;  %v72_v21 = vsel %vm71_vm5, %v499_v18, %v500_v17 }
  0x7e   :  { %v79_v22 = vsel %vm625_vm7, 0.0, %v73_v20  ;;  %v78_v23 = vsel %vm48_vm8, 0.0, %v72_v21 }
  0x7f   :  { %v83_v24 = vpack.c.bf16 %v79_v22, %v79_v22  ;;  %v82_v25 = vpack.c.bf16 %v78_v23, %v78_v23 }
  0x81   :  { %453 = vmatprep.subr.msk.bf16.mxu0 %vm105_vm9, %v83_v24  ;;  %v107_v26 = vsel %vm105_vm9, %v82_v25, 0 }
  0x82   :  { %115 = vmatpush1.bf16.msra.mxu0 %v107_v26 }
  0x85   :  { %454 = vmatmul.mubr.msk.bf16.vlgmr.msra.gmra.mrb[0].mxu0 %vm98_vm10, %v528_v27 }
  0x86   :  { %154 = vmatprep.mubr.bf16.mxu0 %v563_v3 }
 0x158   :  { %v146_v28 = vpop.f32.mrb[0].mxu0 }
 0x159   :  { %v148_v29 = vpop.f32.mrb[1].mxu0  ;;  %v187_v30 = vmul.f32 %v146_v28, %v146_v28 }
 0x15a   :  { %v150_v31 = vpop.f32.mrb[2].mxu0  ;;  %v179_v32 = vadd.f32 %v148_v29, %v146_v28  ;;  %v188_v33 = vmul.f32 %v148_v29, %v148_v29 }
 0x15b   :  { %v152_v34 = vpop.f32.mrb[3].mxu0  ;;  %v189_v35 = vmul.f32 %v150_v31, %v150_v31 }
 0x15c   :  { %180 = vadd.xlane.f32.xlu1 %v179_v32  ;;  %v191_v36 = vadd.f32 %v188_v33, %v187_v30  ;;  %v182_v37 = vadd.f32 %v152_v34, %v150_v31  ;;  %v190_v38 = vmul.f32 %v152_v34, %v152_v34 }
 0x15e   :  { %192 = vadd.xlane.f32.xlu0 %v191_v36  ;;  %v194_v39 = vadd.f32 %v190_v38, %v189_v35 }
 0x160   :  { %183 = vadd.xlane.f32.xlu1 %v182_v37 }
 0x164   :  { %195 = vadd.xlane.f32.xlu1 %v194_v39 }
 0x1e9   :  { %v181_v40 = vpop.xlane.xlu1 %180 }
 0x1ea   :  { %v185_v41 = vmul.f32 0.00390625, %v181_v40 }
 0x1eb   :  { %v193_v42 = vpop.xlane.xlu0 %192 }
 0x1ec   :  { %v199_v43 = vmul.f32 %v185_v41, %v185_v41  ;;  %v197_v44 = vmul.f32 0.00390625, %v193_v42 }
 0x1ed   :  { %v184_v45 = vpop.xlane.xlu1 %183 }
 0x1ee   :  { %v201_v46 = vsub.f32 %v197_v44, %v199_v43  ;;  %v186_v47 = vmul.f32 0.00390625, %v184_v45 }
 0x1f0   :  { %v203_v48 = vadd.f32 1e-05, %v201_v46  ;;  %v200_v50 = vmul.f32 %v186_v47, %v186_v47 }
 0x1f1   :  { %v196_v49 = vpop.xlane.xlu1 %195 }
 0x1f2   :  { %531 = vrsqrt.f32 %v203_v48  ;;  %v198_v51 = vmul.f32 0.00390625, %v196_v49  ;;  %v529_v48 = vld [vmem:[%s741_s2] sm:$0xff]  }
 0x1f4   :  { %v202_v52 = vsub.f32 %v198_v51, %v200_v50 }
 0x1f6   :  { %v204_v54 = vadd.f32 1e-05, %v202_v52 }
 0x1f8   :  { %533 = vrsqrt.f32 %v204_v54 }
 0x1fc   :  { %v532_v56 = vpop.eup %531 }
 0x1fd   :  { %v207_v57 = vmul.f32 %v532_v56, %v645_v55 }
 0x1ff   :  { %v223_v58 = vmul.f32 %v207_v57, %v185_v41 }
 0x201   :  { %227 = vrot.lane.b32.xlu1 %v223_v58, %s564_s19 }
 0x202   :  { %v534_v60 = vpop.eup %533 }
 0x203   :  { %v208_v61 = vmul.f32 %v534_v60, %v651_v59 }
 0x205   :  { %v224_v62 = vmul.f32 %v208_v61, %v186_v47 }
 0x207   :  { %229 = vrot.lane.b32.xlu1 %v224_v62, %s564_s19  ;;  %v568_v62 = vmov 2  }
 0x20b   :  { %211 = vperm.xlu1 %501, %v207_v57  }
 0x20f   :  { %216 = vperm.xlu1 %501, %v208_v61  }
 0x213   :  { %503 = vset.pattern.permute.xlu1 %v567_v53 }
 0x273   :  { %v228_v63 = vpop.permute.xlu1 %227 }
 0x274   :  { %v233_v0 = vsub.f32 %v645_v55, %v228_v63  ;;  %v530_v63 = vld [vmem:[%s740_s1 + $0x8] sm:$0xff]   ;;  %s571_s1 = smov [#allocation2]  }
 0x275   :  { %455 = vmatmul.mubr.msk.bf16.gmra.mrb[4].mxu0 %vm98_vm10, %v530_v63  ;;  %s432_s28 = sshll.u32 %s571_s1, 4  ;;  %s433_s28 = int_to_ptr.vmem [resolvable:$true] %s432_s28 }
 0x276   :  { %237 = vperm.xlu0 %502, %v233_v0   ;;  %s539_s29 = scalar_lea.vmem %s433_s28, 512  ;;  %p544_p1 = scmp.lt.s32.totalorder %s433_s28, %s433_s28 }
 0x277   :  { %p540_p0 = scmp.ne.s32.totalorder %s433_s28, %s539_s29  ;;  %p545_p2 = scmp.lt.s32.totalorder %s539_s29, %s539_s29 }
 0x279   :  { %v230_v1 = vpop.permute.xlu1 %229  ;;  %p546_p3 = por %p545_p2, %p544_p1 }
 0x27a   :  { %v234_v2 = vsub.f32 %v651_v59, %v230_v1 }
 0x27b   :  { %p547_p4 = pnand %p546_p3, %p540_p0 }
 0x27c   :  { %242 = vperm.xlu1 %503, %v234_v2  }
 0x280   :  { %524 = vset.pattern.permute.xlu1 %v568_v62 }
 0x28a   :  { %v212_v3 = vpop.permute.xlu1 %211 }
 0x28b   :  { %v219_v7 = vmul.f32 %v212_v3, %v146_v28  ;;  %v220_v8 = vmul.f32 %v212_v3, %v148_v29 }
 0x28e   :  { %v217_v4 = vpop.permute.xlu1 %216 }
 0x28f   :  { %v221_v10 = vmul.f32 %v217_v4, %v150_v31  ;;  %v222_v11 = vmul.f32 %v217_v4, %v152_v34 }
 0x2f5   :  { %v238_v6 = vpop.permute.xlu0 %237 }
 0x2f6   :  { %v245_v12 = vadd.f32 %v238_v6, %v219_v7  ;;  %v246_v13 = vadd.f32 %v238_v6, %v220_v8 }
 0x2f8   :  { %v249_v17 = vmax.f32 %v245_v12, 0.0  ;;  %v250_v18 = vmax.f32 %v246_v13, 0.0 }
 0x2fb   :  { %v243_v14 = vpop.permute.xlu1 %242 }
 0x2fc   :  { %v247_v15 = vadd.f32 %v243_v14, %v221_v10  ;;  %v248_v16 = vadd.f32 %v243_v14, %v222_v11 }
 0x2fe   :  { %v251_v20 = vmax.f32 %v247_v15, 0.0  ;;  %v252_v21 = vmax.f32 %v248_v16, 0.0  ;;  %v569_v16 = vmov 3  }
 0x2ff   :  { %526 = vset.pattern.permute.xlu0 %v569_v16 }
 0x300   :  { %v504_v22 = vpack.i.bf16 %v251_v20, %v249_v17  ;;  %v509_v23 = vpack.i.bf16 %v252_v21, %v250_v18  ;;  %v290_v24 = vpack.c.bf16 %v252_v21, %v250_v18  ;;  %v289_v25 = vpack.c.bf16 %v251_v20, %v249_v17 }
 0x302   :  { %505 = vrot.lane.b32.xlu1 %v504_v22, %s564_s19 }
 0x306   :  { %510 = vrot.lane.b32.xlu1 %v509_v23, %s564_s19 }
 0x30a   :  { %515 = vrot.lane.b32.xlu1 %v504_v22, %s565_s20 }
 0x30e   :  { %520 = vrot.lane.b32.xlu1 %v509_v23, %s565_s20 }
 0x374   :  { %v506_v26 = vpop.permute.xlu1 %505 }
 0x375   :  { %v508_v28 = vunpack.i.h.bf16 %v506_v26  ;;  %v507_v29 = vunpack.i.l.bf16 %v506_v26 }
 0x378   :  { %v511_v27 = vpop.permute.xlu1 %510 }
 0x379   :  { %v513_v30 = vunpack.i.h.bf16 %v511_v27  ;;  %v512_v31 = vunpack.i.l.bf16 %v511_v27 }
 0x37b   :  { %v263_v32 = vsel %vm58_vm0, %v507_v29, %v512_v31  ;;  %v264_v33 = vsel %vm58_vm0, %v508_v28, %v513_v30  ;;  %v265_v34 = vsel %vm58_vm0, %v512_v31, %v507_v29  ;;  %v266_v35 = vsel %vm58_vm0, %v513_v30, %v508_v28  ;;  %vm474_vm0 = vmpackc.low %vm472_vm14, %vm472_vm14 }
 0x37c   :  { %v516_v36 = vpop.permute.xlu1 %515  ;;  %v460_v37 = vpack.c.bf16 %v264_v33, %v263_v32  ;;  %v465_v38 = vpack.c.bf16 %v266_v35, %v265_v34 }
 0x37d   :  { %v518_v9 = vunpack.i.h.bf16 %v516_v36  ;;  %v517_v40 = vunpack.i.l.bf16 %v516_v36 }
 0x37e   :  { %461 = vmatprep.subr.msk.bf16.mxu1 %vm459_vm11, %v460_v37 }
 0x37f   :  { %466 = vmatpush1.bf16.msk.msra.mxu1 %vm464_vm12, %v465_v38 }
 0x380   :  { %v521_v39 = vpop.permute.xlu1 %520  ;;  %304 = vmatprep.subr.bf16.mxu1 %v290_v24  ;;  %v570_v24 = vmov 4  }
 0x381   :  { %v523_v41 = vunpack.i.h.bf16 %v521_v39  ;;  %v522_v42 = vunpack.i.l.bf16 %v521_v39 }
 0x383   :  { %v279_v43 = vsel %vm71_vm5, %v517_v40, %v522_v42  ;;  %v280_v44 = vsel %vm71_vm5, %v518_v9, %v523_v41  ;;  %v281_v45 = vsel %vm71_vm5, %v522_v42, %v517_v40  ;;  %v282_v19 = vsel %vm71_vm5, %v523_v41, %v518_v9  ;;  %305 = vmatpush1.bf16.msra.mxu1 %v289_v25  ;;  %v156_v25 = vpop.f32.mrb[4].mxu0 }
 0x384   :  { %v470_v46 = vpack.c.bf16 %v282_v19, %v281_v45  ;;  %v475_v47 = vpack.c.bf16 %v280_v44, %v279_v43  ;;  %v158_v26 = vpop.f32.mrb[5].mxu0 }
 0x385   :  { %v160_v27 = vpop.f32.mrb[6].mxu0 }
 0x386   :  { %471 = vmatprep.subr.msk.bf16.mxu1 %vm469_vm15, %v470_v46  ;;  %v162_v28 = vpop.f32.mrb[7].mxu0 }
 0x387   :  { %476 = vmatpush1.bf16.msk.msra.mxu1 %vm474_vm0, %v475_v47 }
 0x38a   :  { %477 = vmatmul.mubr.msk.bf16.vlgmr.msra.gmra.mrb[0].mxu1 %vm298_vm1, %v529_v48 }
 0x45d   :  { %v691_v49 = vpop.f32.mrb[0].mxu1 }
 0x45e   :  { %v693_v50 = vpop.f32.mrb[1].mxu1  ;;  %v353_v5 = vmul.f32 %v691_v49, %v691_v49 }
 0x45f   :  { %v697_v51 = vpop.f32.mrb[2].mxu1  ;;  %v345_v52 = vadd.f32 %v693_v50, %v691_v49  ;;  %v354_v53 = vmul.f32 %v693_v50, %v693_v50 }
 0x460   :  { %v703_v54 = vpop.f32.mrb[3].mxu1  ;;  %v355_v56 = vmul.f32 %v697_v51, %v697_v51 }
 0x461   :  { %v356_v57 = vmul.f32 %v703_v54, %v703_v54  ;;  %346 = vadd.xlane.f32.xlu1 %v345_v52  ;;  %v348_v58 = vadd.f32 %v703_v54, %v697_v51  ;;  %v357_v60 = vadd.f32 %v354_v53, %v353_v5 }
 0x463   :  { %349 = vadd.xlane.f32.xlu0 %v348_v58  ;;  %v360_v61 = vadd.f32 %v356_v57, %v355_v56 }
 0x465   :  { %358 = vadd.xlane.f32.xlu1 %v357_v60 }
 0x469   :  { %361 = vadd.xlane.f32.xlu1 %v360_v61 }
 0x4ee   :  { %v347_v0 = vpop.xlane.xlu1 %346 }
 0x4ef   :  { %v351_v1 = vmul.f32 0.00390625, %v347_v0 }
 0x4f0   :  { %v350_v2 = vpop.xlane.xlu0 %349 }
 0x4f1   :  { %v365_v4 = vmul.f32 %v351_v1, %v351_v1  ;;  %v352_v6 = vmul.f32 0.00390625, %v350_v2 }
 0x4f2   :  { %v359_v3 = vpop.xlane.xlu1 %358 }
 0x4f3   :  { %v363_v7 = vmul.f32 0.00390625, %v359_v3  ;;  %v366_v11 = vmul.f32 %v352_v6, %v352_v6 }
 0x4f5   :  { %v367_v8 = vsub.f32 %v363_v7, %v365_v4 }
 0x4f6   :  { %v362_v10 = vpop.xlane.xlu1 %361 }
 0x4f7   :  { %v369_v12 = vadd.f32 1e-05, %v367_v8  ;;  %v364_v13 = vmul.f32 0.00390625, %v362_v10 }
 0x4f9   :  { %535 = vrsqrt.f32 %v369_v12  ;;  %v368_v14 = vsub.f32 %v364_v13, %v366_v11 }
 0x4fb   :  { %v370_v15 = vadd.f32 1e-05, %v368_v14 }
 0x4fd   :  { %537 = vrsqrt.f32 %v370_v15 }
 0x503   :  { %v536_v17 = vpop.eup %535 }
 0x504   :  { %v373_v18 = vmul.f32 %v536_v17, %v645_v55 }
 0x506   :  { %v389_v20 = vmul.f32 %v373_v18, %v351_v1 }
 0x507   :  { %v538_v21 = vpop.eup %537 }
 0x508   :  { %393 = vrot.lane.b32.xlu1 %v389_v20, %s564_s19  ;;  %v374_v22 = vmul.f32 %v538_v21, %v651_v59 }
 0x50a   :  { %v390_v23 = vmul.f32 %v374_v22, %v352_v6 }
 0x50c   :  { %377 = vperm.xlu1 %524, %v373_v18   ;;  %395 = vrot.lane.b32.xlu0 %v390_v23, %s564_s19 }
 0x510   :  { %382 = vperm.xlu1 %524, %v374_v22  }
 0x514   :  { %525 = vset.pattern.permute.xlu1 %v570_v24 }
 0x515   :  { %167 = vperm.xlu1 %525, %v645_v55  }
 0x519   :  { %172 = vperm.xlu1 %525, %v651_v59  }
 0x51d   :  { %527 = vset.pattern.permute.xlu1 %v569_v16 }
 0x57a   :  { %v394_v29 = vpop.permute.xlu1 %393 }
 0x57b   :  { %v399_v30 = vsub.f32 %v645_v55, %v394_v29 }
 0x57d   :  { %403 = vperm.xlu0 %526, %v399_v30  }
 0x57e   :  { %v396_v31 = vpop.permute.xlu0 %395 }
 0x57f   :  { %v400_v32 = vsub.f32 %v651_v59, %v396_v31 }
 0x581   :  { %408 = vperm.xlu1 %527, %v400_v32  }
 0x58b   :  { %v378_v33 = vpop.permute.xlu1 %377 }
 0x58c   :  { %v385_v36 = vmul.f32 %v378_v33, %v691_v49  ;;  %v386_v37 = vmul.f32 %v378_v33, %v693_v50 }
 0x58f   :  { %v383_v34 = vpop.permute.xlu1 %382 }
 0x590   :  { %v387_v55 = vmul.f32 %v383_v34, %v697_v51  ;;  %v388_v43 = vmul.f32 %v383_v34, %v703_v54 }
 0x594   :  { %v168_v35 = vpop.permute.xlu1 %167 }
 0x595   :  { %v175_v9 = vadd.f32 %v168_v35, %v156_v25  ;;  %v176_v40 = vadd.f32 %v168_v35, %v158_v26 }
 0x598   :  { %v173_v38 = vpop.permute.xlu1 %172 }
 0x599   :  { %v177_v45 = vadd.f32 %v173_v38, %v160_v27  ;;  %v178_v19 = vadd.f32 %v173_v38, %v162_v28 }
 0x5fc   :  { %v404_v39 = vpop.permute.xlu0 %403 }
 0x5fd   :  { %v411_v41 = vadd.f32 %v404_v39, %v385_v36  ;;  %v412_v42 = vadd.f32 %v404_v39, %v386_v37 }
 0x5ff   :  { %v415_v44 = vadd.f32 %v411_v41, %v175_v9  ;;  %v416_v59 = vadd.f32 %v412_v42, %v176_v40 }
 0x600   :  { %v409_v46 = vpop.permute.xlu1 %408 }
 0x601   :  { %v419_v47 = vmax.f32 %v415_v44, 0.0  ;;  %v420_v48 = vmax.f32 %v416_v59, 0.0  ;;  %v413_v49 = vadd.f32 %v409_v46, %v387_v55  ;;  %v414_v5 = vadd.f32 %v409_v46, %v388_v43 }
 0x603   :  { %423 = vst [vmem:[#allocation2] sm:$0xff] %v419_v47  ;;  %424 = vst [vmem:[#allocation2 + $0x8] sm:$0xff] %v420_v48  ;;  %v417_v50 = vadd.f32 %v413_v49, %v177_v45  ;;  %v418_v52 = vadd.f32 %v414_v5, %v178_v19 }
 0x605   :  { %v421_v53 = vmax.f32 %v417_v50, 0.0  ;;  %v422_v56 = vmax.f32 %v418_v52, 0.0 }
 0x607   :  { %425 = vst [vmem:[#allocation2 + $0x10] sm:$0xff] %v421_v53  ;;  %426 = vst [vmem:[#allocation2 + $0x18] sm:$0xff] %v422_v56 }
 0x608   :  { %550 = shalt.err (!%p547_p4)
}
 0x609   :  { %s551_s6 = scalar_lea.hbm %s743_s4, 512 }
 0x60a   :  { %p552_p5 = scmp.ne.s32.totalorder %s743_s4, %s551_s6  ;;  %p555_p6 = scmp.lt.u32.totalorder %s551_s6, %s743_s4 }
 0x60c   :  { %p557_p7 = pnand %p555_p6, %p552_p5 }
 0x60e   :  { %560 = shalt.err (!%p557_p7)
}
 0x60f   :  { %s572_s11 = smov 256   ;;  %s573_s12 = smov 16  }
 0x610   :  { %438 = dma.vmem_to_hbm [thread:$0]  %s433_s28, 512, %s743_s4, [#allocation3], %s572_s11, %s572_s11, %s573_s12  }
 0x611   :  { %561 = dma.done.wait [#allocation3], 512  }
 0x612   :  { %562 = vsyncadd [#allocation3], 4294966784 }
 0x613   :  { %442 = vsyncpa [#allocation3], 1 }

</bundles_post_ra>
